<compile_context>
chip_gen: v6e
topology: v6e:2x2x1
jax: 0.10.0
libtpu: 0.0.40
codegen_flags: <defaults>
</compile_context>

<pallas_src>
import jax
import jax.numpy as jnp
from jax import lax
from jax.experimental import pallas as pl
from jax.experimental.pallas import tpu as pltpu


def svm_kernel(x_ref, w1_ref, b1_ref, w2_ref, b2_ref, w3_ref, b3_ref, o_ref):
    # x_ref: (TB, F) f32 -- native (batch, feature) tile, batch on sublanes in HBM.
    x = x_ref[...]

    # Layer 1: contract both operands over the feature axis (== W1 @ x.T), so the
    # batch dimension lands on the 128-lane axis: (H1, TB).
    h1 = lax.dot_general(w1_ref[...], x, (((1,), (1,)), ((), ())),
                         preferred_element_type=jnp.float32)
    h1 = jnp.maximum(h1 + b1_ref[...], 0.0)

    # Layer 2: (H2, H1) @ (H1, TB) -> (H2, TB), +bias, ReLU.
    h2 = jnp.dot(w2_ref[...], h1, preferred_element_type=jnp.float32)
    h2 = jnp.maximum(h2 + b2_ref[...], 0.0)

    # Layer 3 (H2 -> 1): VPU multiply + cross-sublane reduce -> (1, TB).
    logits = jnp.sum(h2 * w3_ref[...], axis=0, keepdims=True) + b3_ref[0, 0]

    # Exact sigmoid (kernel is DMA-bound, the f32 divide is free); lane-dense store.
    o_ref[...] = (1.0 / (1.0 + jnp.exp(-logits))).astype(o_ref.dtype)


def _round_up(x: int, m: int) -> int:
    return ((x + m - 1) // m) * m


def _pick_batch_tile(batch: int, max_tile: int = 2048) -> int:
    """Batch tile: multiple of 256, capped at max_tile; keep >= 2 grid steps
    when possible so v7x's two TensorCores both get work."""
    b_ceil = _round_up(batch, 256)
    tb = min(max_tile, b_ceil)
    if b_ceil >= 512:
        tb = min(tb, _round_up(b_ceil // 2, 256))
    return max(tb, 256)


def svm_forward(x, w1, b1, w2, b2, w3, b3, *, max_batch_tile=2048):
    """x: (B, F) f32; weights in PyTorch (out_features, in_features) layout."""
    B, F = x.shape
    H1 = w1.shape[0]
    H2 = w2.shape[0]

    TB = _pick_batch_tile(B, max_batch_tile)
    G = pl.cdiv(B, TB)

    b1c = b1.reshape(H1, 1).astype(jnp.float32)   # broadcast over lanes
    b2c = b2.reshape(H2, 1).astype(jnp.float32)
    w3c = w3.reshape(H2, 1).astype(jnp.float32)   # (1, H2) -> (H2, 1) column
    b3c = b3.reshape(1, 1).astype(jnp.float32)    # SMEM scalar

    out = pl.pallas_call(
        svm_kernel,
        out_shape=jax.ShapeDtypeStruct((1, B), jnp.float32),
        grid=(G,),
        in_specs=[
            pl.BlockSpec((TB, F), lambda i: (i, 0)),            # x tile (pipelined)
            pl.BlockSpec((H1, F), lambda i: (0, 0)),            # resident weights
            pl.BlockSpec((H1, 1), lambda i: (0, 0)),
            pl.BlockSpec((H2, H1), lambda i: (0, 0)),
            pl.BlockSpec((H2, 1), lambda i: (0, 0)),
            pl.BlockSpec((H2, 1), lambda i: (0, 0)),
            pl.BlockSpec(memory_space=pltpu.MemorySpace.SMEM),  # b3 scalar
        ],
        out_specs=pl.BlockSpec((1, TB), lambda i: (0, i)),      # lane-dense output
        compiler_params=pltpu.CompilerParams(
            dimension_semantics=("parallel",)),
    )(x.astype(jnp.float32), w1.astype(jnp.float32), b1c,
      w2.astype(jnp.float32), b2c, w3c, b3c)

    return out.reshape(B, 1)


def svm_reference(x, w1, b1, w2, b2, w3, b3):
    """Plain-JAX fp32 reference (HIGHEST precision matmuls)."""
    hp = jax.lax.Precision.HIGHEST
    h1 = jnp.maximum(jnp.dot(x, w1.T, precision=hp) + b1, 0.0)
    h2 = jnp.maximum(jnp.dot(h1, w2.T, precision=hp) + b2, 0.0)
    logits = jnp.dot(h2, w3.T, precision=hp) + b3
    return 1.0 / (1.0 + jnp.exp(-logits))


def init_params(key, input_shape):
    # PyTorch-Linear-like uniform init, weights stored (out_features, in_features).
    ks = jax.random.split(key, 6)

    def linear(kw, kb, fan_in, fan_out):
        bound = 1.0 / (fan_in ** 0.5)
        w = jax.random.uniform(kw, (fan_out, fan_in), jnp.float32, -bound, bound)
        b = jax.random.uniform(kb, (fan_out,), jnp.float32, -bound, bound)
        return w, b

    w1, b1 = linear(ks[0], ks[1], input_shape, 32)
    w2, b2 = linear(ks[2], ks[3], 32, 64)
    w3, b3 = linear(ks[4], ks[5], 64, 1)
    return w1, b1, w2, b2, w3, b3


if __name__ == "__main__":
    key = jax.random.PRNGKey(0)
    k_x, k_p = jax.random.split(key)

    # Non-tile-multiple batch exercises the partial last block + 2 grid steps.
    B, F = 384, 16
    x = jax.random.normal(k_x, (B, F), dtype=jnp.float32)
    params = init_params(k_p, F)

    out = svm_forward(x, *params)
    jax.block_until_ready(out)

    ref = svm_reference(x, *params)
    assert out.shape == (B, 1), out.shape
    err = float(jnp.max(jnp.abs(out - ref)))
    # Tolerance covers MXU default-precision f32 matmuls vs the HIGHEST reference.
    assert err < 2e-2, err

    print("KERNEL_OK")
</pallas_src>

<mosaic_0001>
module attributes {stable_mosaic.version = 11 : i64} {
  func.func @svm_kernel(%arg0: i32, %arg1: memref<256x16xf32, #tpu.memory_space<vmem>>, %arg2: memref<32x16xf32, #tpu.memory_space<vmem>>, %arg3: memref<32x1xf32, #tpu.memory_space<vmem>>, %arg4: memref<64x32xf32, #tpu.memory_space<vmem>>, %arg5: memref<64x1xf32, #tpu.memory_space<vmem>>, %arg6: memref<64x1xf32, #tpu.memory_space<vmem>>, %arg7: memref<1x1xf32, #tpu.memory_space<smem>>, %arg8: memref<1x256xf32, #tpu.memory_space<vmem>>) attributes {dimension_semantics = [#tpu.dimension_semantics<parallel>], iteration_bounds = array<i64: 2>, scalar_prefetch = 0 : i64, scratch_operands = 0 : i64, tpu.core_type = #tpu.core_type<tc>, window_params = [{transform_indices = @transform_0, window_bounds = array<i64: 256, 16>}, {pipeline_mode = #tpu.pipeline_mode<synchronous>, transform_indices = @transform_1, window_bounds = array<i64: 32, 16>}, {pipeline_mode = #tpu.pipeline_mode<synchronous>, transform_indices = @transform_2, window_bounds = array<i64: 32, 1>}, {pipeline_mode = #tpu.pipeline_mode<synchronous>, transform_indices = @transform_3, window_bounds = array<i64: 64, 32>}, {pipeline_mode = #tpu.pipeline_mode<synchronous>, transform_indices = @transform_4, window_bounds = array<i64: 64, 1>}, {pipeline_mode = #tpu.pipeline_mode<synchronous>, transform_indices = @transform_5, window_bounds = array<i64: 64, 1>}, {transform_indices = @transform_6, window_bounds = array<i64: 1, 1>}, {transform_indices = @transform_7, window_bounds = array<i64: 1, 256>}]} {
    %c0 = arith.constant 0 : index
    %c0_0 = arith.constant 0 : index
    %0 = vector.load %arg1[%c0, %c0_0] : memref<256x16xf32, #tpu.memory_space<vmem>>, vector<256x16xf32>
    %c0_1 = arith.constant 0 : index
    %c0_2 = arith.constant 0 : index
    %1 = vector.load %arg2[%c0_1, %c0_2] : memref<32x16xf32, #tpu.memory_space<vmem>>, vector<32x16xf32>
    %cst = arith.constant dense<0.000000e+00> : vector<32x256xf32>
    %2 = tpu.matmul %1, %0, %cst {dimension_numbers = #tpu.dot_dimension_numbers<[1], [1], [0], [0], [0, 0, 1, 0], [], []>} : vector<32x16xf32>, vector<256x16xf32>, vector<32x256xf32> -> vector<32x256xf32>
    %c0_3 = arith.constant 0 : index
    %c0_4 = arith.constant 0 : index
    %3 = vector.load %arg3[%c0_3, %c0_4] : memref<32x1xf32, #tpu.memory_space<vmem>>, vector<32x1xf32>
    %4 = vector.broadcast %3 : vector<32x1xf32> to vector<32x256xf32>
    %5 = arith.addf %2, %4 : vector<32x256xf32>
    %cst_5 = arith.constant 0.000000e+00 : f32
    %6 = vector.broadcast %cst_5 : f32 to vector<32x256xf32>
    %7 = arith.maximumf %5, %6 : vector<32x256xf32>
    %c0_6 = arith.constant 0 : index
    %c0_7 = arith.constant 0 : index
    %8 = vector.load %arg4[%c0_6, %c0_7] : memref<64x32xf32, #tpu.memory_space<vmem>>, vector<64x32xf32>
    %cst_8 = arith.constant dense<0.000000e+00> : vector<64x256xf32>
    %9 = tpu.matmul %8, %7, %cst_8 {dimension_numbers = #tpu.dot_dimension_numbers<[1], [0], [0], [1], [0, 0, 1, 1], [], []>} : vector<64x32xf32>, vector<32x256xf32>, vector<64x256xf32> -> vector<64x256xf32>
    %c0_9 = arith.constant 0 : index
    %c0_10 = arith.constant 0 : index
    %10 = vector.load %arg5[%c0_9, %c0_10] : memref<64x1xf32, #tpu.memory_space<vmem>>, vector<64x1xf32>
    %11 = vector.broadcast %10 : vector<64x1xf32> to vector<64x256xf32>
    %12 = arith.addf %9, %11 : vector<64x256xf32>
    %cst_11 = arith.constant 0.000000e+00 : f32
    %13 = vector.broadcast %cst_11 : f32 to vector<64x256xf32>
    %14 = arith.maximumf %12, %13 : vector<64x256xf32>
    %c0_12 = arith.constant 0 : index
    %c0_13 = arith.constant 0 : index
    %15 = vector.load %arg6[%c0_12, %c0_13] : memref<64x1xf32, #tpu.memory_space<vmem>>, vector<64x1xf32>
    %16 = vector.broadcast %15 : vector<64x1xf32> to vector<64x256xf32>
    %17 = arith.mulf %14, %16 : vector<64x256xf32>
    %cst_14 = arith.constant dense<0.000000e+00> : vector<256xf32>
    %18 = vector.multi_reduction <add>, %17, %cst_14 [0] : vector<64x256xf32> to vector<256xf32>
    %19 = vector.shape_cast %18 : vector<256xf32> to vector<1x256xf32>
    %c0_15 = arith.constant 0 : index
    %c0_16 = arith.constant 0 : index
    %20 = memref.load %arg7[%c0_15, %c0_16] : memref<1x1xf32, #tpu.memory_space<smem>>
    %21 = vector.broadcast %20 : f32 to vector<1x256xf32>
    %22 = arith.addf %19, %21 : vector<1x256xf32>
    %cst_17 = arith.constant 0.000000e+00 : f32
    %23 = vector.broadcast %cst_17 : f32 to vector<1x256xf32>
    %24 = arith.subf %23, %22 : vector<1x256xf32>
    %25 = math.exp %24 : vector<1x256xf32>
    %cst_18 = arith.constant 1.000000e+00 : f32
    %26 = vector.broadcast %cst_18 : f32 to vector<1x256xf32>
    %27 = arith.addf %26, %25 : vector<1x256xf32>
    %cst_19 = arith.constant 1.000000e+00 : f32
    %28 = vector.broadcast %cst_19 : f32 to vector<1x256xf32>
    %29 = arith.divf %28, %27 : vector<1x256xf32>
    %c0_20 = arith.constant 0 : index
    %c0_21 = arith.constant 0 : index
    %30 = vector.load %arg8[%c0_20, %c0_21] : memref<1x256xf32, #tpu.memory_space<vmem>>, vector<1x256xf32>
    tpu.vector_store %arg8[%c0_20, %c0_21], %29 {strides = array<i32>} : memref<1x256xf32, #tpu.memory_space<vmem>>, vector<1x256xf32>,
    return
  }
  func.func @transform_0(%arg0: i32) -> (i32, i32) {
    %c0_i32 = arith.constant 0 : i32
    %c0_i32_0 = arith.constant 0 : i32
    return %arg0, %c0_i32 : i32, i32
  }
  func.func @transform_1(%arg0: i32) -> (i32, i32) {
    %c0_i32 = arith.constant 0 : i32
    %c0_i32_0 = arith.constant 0 : i32
    %c0_i32_1 = arith.constant 0 : i32
    return %c0_i32, %c0_i32_0 : i32, i32
  }
  func.func @transform_2(%arg0: i32) -> (i32, i32) {
    %c0_i32 = arith.constant 0 : i32
    %c0_i32_0 = arith.constant 0 : i32
    %c0_i32_1 = arith.constant 0 : i32
    return %c0_i32, %c0_i32_0 : i32, i32
  }
  func.func @transform_3(%arg0: i32) -> (i32, i32) {
    %c0_i32 = arith.constant 0 : i32
    %c0_i32_0 = arith.constant 0 : i32
    %c0_i32_1 = arith.constant 0 : i32
    return %c0_i32, %c0_i32_0 : i32, i32
  }
  func.func @transform_4(%arg0: i32) -> (i32, i32) {
    %c0_i32 = arith.constant 0 : i32
    %c0_i32_0 = arith.constant 0 : i32
    %c0_i32_1 = arith.constant 0 : i32
    return %c0_i32, %c0_i32_0 : i32, i32
  }
  func.func @transform_5(%arg0: i32) -> (i32, i32) {
    %c0_i32 = arith.constant 0 : i32
    %c0_i32_0 = arith.constant 0 : i32
    %c0_i32_1 = arith.constant 0 : i32
    return %c0_i32, %c0_i32_0 : i32, i32
  }
  func.func @transform_6(%arg0: i32) -> (i32, i32) {
    %c0_i32 = arith.constant 0 : i32
    %c0_i32_0 = arith.constant 0 : i32
    %c0_i32_1 = arith.constant 0 : i32
    return %c0_i32, %c0_i32_0 : i32, i32
  }
  func.func @transform_7(%arg0: i32) -> (i32, i32) {
    %c0_i32 = arith.constant 0 : i32
    %c0_i32_0 = arith.constant 0 : i32
    return %c0_i32, %arg0 : i32, i32
  }
}

</mosaic_0001>

<bundles_post_ra>
// kernel: tpu_custom_call.1
= control target key start
LH: loop header
LB: loop body
LE: loop exit
PB: predicated region body
PF: predicated region fallthrough
CT: control target
= control target key end

     0   :  { %s1538_s0 = inlined_call_operand.vmem [shape: f32[384,16], index: 0, kind: input, shape index: {}]   ;;  %s1539_s1 = inlined_call_operand.vmem [shape: f32[32,16], index: 1, kind: input, shape index: {}]   ;;  %s1540_s2 = inlined_call_operand.vmem [shape: f32[32,1], index: 2, kind: input, shape index: {}]   ;;  %s1541_s3 = inlined_call_operand.vmem [shape: f32[64,32], index: 3, kind: input, shape index: {}]   ;;  %s1542_s4 = inlined_call_operand.vmem [shape: f32[64,1], index: 4, kind: input, shape index: {}]   ;;  %s1543_s5 = inlined_call_operand.vmem [shape: f32[64,1], index: 5, kind: input, shape index: {}]   ;;  %s1544_s6 = inlined_call_operand.<no memory space> [shape: f32[1,1], index: 6, kind: input, shape index: {}]   ;;  %s1545_s7 = inlined_call_operand.hbm [shape: f32[1,384], index: 7, kind: output, shape index: {}]  }
   0x1   :  { %12 = sst [smem:[#allocation2]] %s1544_s6 }
   0x2   :  { %13 = vsyncpa [#allocation4], 0 }
   0x3   :  { %15 = vsyncpa [#allocation4 + $0x1], 0  ;;  %s1248_s26 = smov 0   ;;  %s1250_s27 = smov 0  }
   0x4   :  { %s1252_s28 = smov 0   ;;  %s1254_s29 = smov 0  }
   0x5 LB: > { %s1269_s6 = sadd.s32 4294967295, %s1199_s29   ;;  %s989_s30 = sadd.s32 4294967294, %s1199_s29   ;;  %s1199_s29 = sphi %s1254_s29, %s1551_s29   ;;  %s1195_s28 = sphi %s1252_s28, %s1550_s28   ;;  %s1191_s27 = sphi %s1250_s27, %s1549_s27   ;;  %s1187_s26 = sphi %s1248_s26, %s1548_s26  }
   0x6   : > { %s1273_s8 = sadd.s32 1, %s1199_s29   ;;  %s180_s9 = sadd.s32 1, %s1195_s28 }
   0x7   : > { %s177_s10 = ssub.s32 %s1199_s29, %s1273_s8  ;;  %p190_p0 = scmp.ne.s32.totalorder %s1195_s28, %s1191_s27 }
   0x8   : > { %p178_p1 = scmp.eq.s32.totalorder %s177_s10, 0  ;;  %p191_p2 = scmp.eq.s32.totalorder %s1269_s6, 1 }
   0x9   : > { %p196_p3 = scmp.ne.s32.totalorder %s1191_s27, %s1187_s26  ;;  %p197_p4 = scmp.eq.s32.totalorder %s989_s30, 1 }
   0xa   : > { %s1284_s11 = scalar_select %p178_p1, %s1195_s28, %s180_s9  }
   0xb   : > { %p1286_p5 = por %p191_p2, %p190_p0  ;;  %p1290_p6 = por %p197_p4, %p196_p3 }
   0xc   : > { %p992_p7 = scmp.ge.s32.totalorder %s1199_s29, 1  ;;  %p250_p8 = scmp.lt.s32.totalorder %s1199_s29, 3 }
   0xe   : > { %p251_p9 = pnand %p992_p7, %p250_p8 }
   0xf   : > { %s1297_s14 = sshll.u32 (!%p251_p9), %s1269_s6, 5  ;;  %s283_s16 = sand.u32 (!%p251_p9), 1, %s1191_s27  }
  0x10   : > { %254 = sbr.rel (%p251_p9) target bundleno = 621 (0x26d), region = 48  ;;  %p291_p10 = scmp.lt.s32.totalorder (!%p251_p9), %s1297_s14, 47 }
  0x11   : > { %s871_s17 = sld [smem:[#allocation2]] (!%p251_p9)  ;;  %s993_s18 = sshll.u32 (!%p251_p9), %s283_s16, 1 }
  0x12   : > { %s285_s19 = scalar_lea.vmem (!%p251_p9), [#allocation3], %s993_s18  ;;  %s1491_s20 = scalar_lea.sflag (!%p251_p9), [#allocation4], %s283_s16 }
  0x15   : > { %vm365_vm0 = vcmask 130048   ;;  %v1302_v0 = vld [vmem:[%s1539_s1] sm:$0xff]  ;;  %v1201_v1 = vmov 0   ;;  %v344_v2 = vld [vmem:[%s1540_s2 + $0x18] sm:$0xff]  ;;  %v342_v3 = vld [vmem:[%s1540_s2 + $0x8] sm:$0xff]  ;;  %s292_s21 = scalar_select %p291_p10, %s1297_s14, 47 }
  0x16   : > { %1080 = vmatprep.mubr.msk.f32.mxu0 %vm365_vm0, %v1302_v0  ;;  %1129 = vset.pattern.permute.xlu0 %v1201_v1  ;;  %v343_v4 = vld [vmem:[%s1540_s2 + $0x10] sm:$0xff]  ;;  %v341_v5 = vld [vmem:[%s1540_s2] sm:$0xff]  ;;  %v580_v10 = vld [vmem:[%s1542_s4 + $0x8] sm:$0xff]  ;;  %v1202_v57 = vmov 0.0   ;;  %vm627_vm1 = vcmask 261120  }
  0x17   : > { %362 = vperm.xlu0 %1129, %v344_v2   ;;  %1130 = vset.pattern.permute.xlu1 %v1201_v1  ;;  %s995_s30 = sshll.u32 %s292_s21, 3  ;;  %v579_v6 = vld [vmem:[%s1542_s4] sm:$0xff]  ;;  %v581_v13 = vld [vmem:[%s1542_s4 + $0x10] sm:$0xff]  ;;  %v582_v14 = vld [vmem:[%s1542_s4 + $0x18] sm:$0xff]  ;;  %s1041_s21 = sshll.u32 (%p1286_p5), %s1269_s6, 1 }
  0x18   : > { %352 = vperm.xlu1 %1130, %v342_v3   ;;  %s1323_s15 = scalar_lea.vmem %s1538_s0, %s995_s30  ;;  %v781_v17 = vld [vmem:[%s1543_s5] sm:$0xff]  ;;  %v782_v18 = vld [vmem:[%s1543_s5 + $0x8] sm:$0xff]  ;;  %v783_v22 = vld [vmem:[%s1543_s5 + $0x10] sm:$0xff]  ;;  %716 = vmatprep.mubr.f32.mxu1 %v1202_v57  ;;  %s919_s22 = ssub.s32 (%p1286_p5), 3, %s1041_s21 }
  0x19   : > { %v336_v7 = vld [vmem:[%s1323_s15 + $0xf8] sm:$0xff]  ;;  %v335_v9 = vld [vmem:[%s1323_s15 + $0xf0] sm:$0xff]  ;;  %v334_v12 = vld [vmem:[%s1323_s15 + $0xe8] sm:$0xff]  ;;  %p920_p11 = scmp.lt.s32.totalorder (%p1286_p5), %s919_s22, 2 }
  0x1a   : > { %v320_v8 = vld [vmem:[%s1323_s15 + $0x78] sm:$0xff]  ;;  %1048 = vmatprep.subr.msk.mxu0 %vm365_vm0, %v336_v7  ;;  %v319_v11 = vld [vmem:[%s1323_s15 + $0x70] sm:$0xff]  ;;  %v318_v15 = vld [vmem:[%s1323_s15 + $0x68] sm:$0xff] }
  0x1b   : > { %357 = vperm.xlu0 %1129, %v343_v4   ;;  %1049 = vmatpush3.xpose.msk.msra.mxu0 %vm365_vm0, %v320_v8  ;;  %v333_v16 = vld [vmem:[%s1323_s15 + $0xe0] sm:$0xff]  ;;  %v332_v20 = vld [vmem:[%s1323_s15 + $0xd8] sm:$0xff]  ;;  %v331_v24 = vld [vmem:[%s1323_s15 + $0xd0] sm:$0xff] }
  0x1c   : > { %347 = vperm.xlu1 %1130, %v341_v5   ;;  %1050 = vmatprep.subr.msk.mxu0 %vm365_vm0, %v335_v9  ;;  %v317_v19 = vld [vmem:[%s1323_s15 + $0x60] sm:$0xff]  ;;  %v316_v23 = vld [vmem:[%s1323_s15 + $0x58] sm:$0xff]  ;;  %v584_v25 = vld [vmem:[%s1542_s4 + $0x28] sm:$0xff] }
  0x1d   : > { %v583_v21 = vld [vmem:[%s1542_s4 + $0x20] sm:$0xff]  ;;  %v784_v26 = vld [vmem:[%s1543_s5 + $0x18] sm:$0xff]  ;;  %v315_v27 = vld [vmem:[%s1323_s15 + $0x50] sm:$0xff] }
  0x1e   : > { %v330_v28 = vld [vmem:[%s1323_s15 + $0xc8] sm:$0xff]  ;;  %v585_v29 = vld [vmem:[%s1542_s4 + $0x30] sm:$0xff]  ;;  %v785_v30 = vld [vmem:[%s1543_s5 + $0x20] sm:$0xff] }
  0x1f   : > { %589 = vperm.xlu0 %1129, %v579_v6   ;;  %1051 = vmatpush3.xpose.msk.msra.mxu0 %vm365_vm0, %v319_v11  ;;  %v314_v31 = vld [vmem:[%s1323_s15 + $0x48] sm:$0xff]  ;;  %v329_v32 = vld [vmem:[%s1323_s15 + $0xc0] sm:$0xff]  ;;  %v586_v33 = vld [vmem:[%s1542_s4 + $0x38] sm:$0xff] }
  0x20   : > { %594 = vperm.xlu1 %1130, %v580_v10   ;;  %1052 = vmatprep.subr.msk.mxu0 %vm365_vm0, %v334_v12  ;;  %v786_v34 = vld [vmem:[%s1543_s5 + $0x28] sm:$0xff]  ;;  %v313_v35 = vld [vmem:[%s1323_s15 + $0x40] sm:$0xff]  ;;  %v328_v36 = vld [vmem:[%s1323_s15 + $0xb8] sm:$0xff] }
  0x21   : > { %v787_v37 = vld [vmem:[%s1543_s5 + $0x30] sm:$0xff]  ;;  %v788_v38 = vld [vmem:[%s1543_s5 + $0x38] sm:$0xff]  ;;  %v326_v42 = vld [vmem:[%s1323_s15 + $0xa8] sm:$0xff] }
  0x22   : > { %v312_v39 = vld [vmem:[%s1323_s15 + $0x38] sm:$0xff]  ;;  %v327_v40 = vld [vmem:[%s1323_s15 + $0xb0] sm:$0xff]  ;;  %v310_v43 = vld [vmem:[%s1323_s15 + $0x28] sm:$0xff] }
  0x23   : > { %599 = vperm.xlu0 %1129, %v581_v13   ;;  %1053 = vmatpush3.xpose.msk.msra.mxu0 %vm365_vm0, %v318_v15  ;;  %v311_v41 = vld [vmem:[%s1323_s15 + $0x30] sm:$0xff]  ;;  %v325_v44 = vld [vmem:[%s1323_s15 + $0xa0] sm:$0xff]  ;;  %v324_v46 = vld [vmem:[%s1323_s15 + $0x98] sm:$0xff] }
  0x24   : > { %604 = vperm.xlu1 %1130, %v582_v14   ;;  %1054 = vmatprep.subr.msk.mxu0 %vm365_vm0, %v333_v16  ;;  %v309_v45 = vld [vmem:[%s1323_s15 + $0x20] sm:$0xff]  ;;  %v308_v47 = vld [vmem:[%s1323_s15 + $0x18] sm:$0xff]  ;;  %v323_v48 = vld [vmem:[%s1323_s15 + $0x90] sm:$0xff] }
  0x25   : > { %v307_v49 = vld [vmem:[%s1323_s15 + $0x10] sm:$0xff]  ;;  %v322_v50 = vld [vmem:[%s1323_s15 + $0x88] sm:$0xff]  ;;  %v321_v52 = vld [vmem:[%s1323_s15 + $0x80] sm:$0xff] }
  0x26   : > { %v306_v51 = vld [vmem:[%s1323_s15 + $0x8] sm:$0xff]  ;;  %v305_v53 = vld [vmem:[%s1323_s15] sm:$0xff]  ;;  %v339_v55 = vld [vmem:[%s1539_s1 + $0x10] sm:$0xff] }
  0x27   : > { %791 = vperm.xlu0 %1129, %v781_v17   ;;  %1055 = vmatpush3.xpose.msk.msra.mxu0 %vm365_vm0, %v317_v19  ;;  %v338_v54 = vld [vmem:[%s1539_s1 + $0x8] sm:$0xff]  ;;  %v340_v56 = vld [vmem:[%s1539_s1 + $0x18] sm:$0xff] }
  0x28   : > { %796 = vperm.xlu1 %1130, %v782_v18   ;;  %1056 = vmatprep.subr.msk.mxu0 %vm365_vm0, %v332_v20 }
  0x2b   : > { %609 = vperm.xlu0 %1129, %v583_v21   ;;  %1057 = vmatpush3.xpose.msk.msra.mxu0 %vm365_vm0, %v316_v23  ;;  %v572_v23 = vld [vmem:[%s1541_s3 + $0x8] sm:$0xff] }
  0x2c   : > { %801 = vperm.xlu1 %1130, %v783_v22   ;;  %1058 = vmatprep.subr.msk.mxu0 %vm365_vm0, %v331_v24  ;;  %v571_v22 = vld [vmem:[%s1541_s3] sm:$0xff]  ;;  %v573_v24 = vld [vmem:[%s1541_s3 + $0x10] sm:$0xff] }
  0x2f   : > { %614 = vperm.xlu0 %1129, %v584_v25   ;;  %1059 = vmatpush3.xpose.msk.msra.mxu0 %vm365_vm0, %v315_v27  ;;  %v574_v25 = vld [vmem:[%s1541_s3 + $0x18] sm:$0xff]  ;;  %v576_v27 = vld [vmem:[%s1541_s3 + $0x28] sm:$0xff] }
  0x30   : > { %806 = vperm.xlu1 %1130, %v784_v26   ;;  %1060 = vmatprep.subr.msk.mxu0 %vm365_vm0, %v330_v28  ;;  %v575_v26 = vld [vmem:[%s1541_s3 + $0x20] sm:$0xff]  ;;  %v577_v28 = vld [vmem:[%s1541_s3 + $0x30] sm:$0xff] }
  0x33   : > { %619 = vperm.xlu0 %1129, %v585_v29   ;;  %1061 = vmatpush3.xpose.msk.msra.mxu0 %vm365_vm0, %v314_v31  ;;  %v578_v29 = vld [vmem:[%s1541_s3 + $0x38] sm:$0xff] }
  0x34   : > { %811 = vperm.xlu1 %1130, %v785_v30   ;;  %1062 = vmatprep.subr.msk.mxu0 %vm365_vm0, %v329_v32 }
  0x37   : > { %624 = vperm.xlu0 %1129, %v586_v33   ;;  %1063 = vmatpush3.xpose.msk.msra.mxu0 %vm365_vm0, %v313_v35 }
  0x38   : > { %816 = vperm.xlu1 %1130, %v786_v34   ;;  %1064 = vmatprep.subr.msk.mxu0 %vm365_vm0, %v328_v36 }
  0x3b   : > { %821 = vperm.xlu0 %1129, %v787_v37   ;;  %1065 = vmatpush3.xpose.msk.msra.mxu0 %vm365_vm0, %v312_v39 }
  0x3c   : > { %826 = vperm.xlu1 %1130, %v788_v38   ;;  %1066 = vmatprep.subr.msk.mxu0 %vm365_vm0, %v327_v40 }
  0x3f   : > { %1067 = vmatpush3.xpose.msk.msra.mxu0 %vm365_vm0, %v311_v41 }
  0x40   : > { %1068 = vmatprep.subr.msk.mxu0 %vm365_vm0, %v326_v42 }
  0x43   : > { %1069 = vmatpush3.xpose.msk.msra.mxu0 %vm365_vm0, %v310_v43 }
  0x44   : > { %1070 = vmatprep.subr.msk.mxu0 %vm365_vm0, %v325_v44 }
  0x47   : > { %1071 = vmatpush3.xpose.msk.msra.mxu0 %vm365_vm0, %v309_v45 }
  0x48   : > { %1072 = vmatprep.subr.msk.mxu0 %vm365_vm0, %v324_v46 }
  0x4b   : > { %1073 = vmatpush3.xpose.msk.msra.mxu0 %vm365_vm0, %v308_v47 }
  0x4c   : > { %1074 = vmatprep.subr.msk.mxu0 %vm365_vm0, %v323_v48 }
  0x4f   : > { %1075 = vmatpush3.xpose.msk.msra.mxu0 %vm365_vm0, %v307_v49 }
  0x50   : > { %1076 = vmatprep.subr.msk.mxu0 %vm365_vm0, %v322_v50 }
  0x53   : > { %1077 = vmatpush3.xpose.msk.msra.mxu0 %vm365_vm0, %v306_v51 }
  0x54   : > { %1078 = vmatprep.subr.msk.mxu0 %vm365_vm0, %v321_v52 }
  0x57   : > { %1079 = vmatpush3.xpose.msk.msra.mxu0 %vm365_vm0, %v305_v53 }
  0x5a   : > { %1081 = vmatmul.mubr.msk.f32.vlgmr.msra.gmra.mxu0 %vm365_vm0, %v1302_v0 }
  0x5b   : > { %1082 = vmatprep.mubr.msk.f32.mxu0 %vm365_vm0, %v338_v54 }
  0x5e   : > { %1083 = vmatmul.mubr.msk.f32.gmra.mxu0 %vm365_vm0, %v338_v54 }
  0x5f   : > { %1084 = vmatprep.mubr.msk.f32.mxu0 %vm365_vm0, %v339_v55 }
  0x62   : > { %1085 = vmatmul.mubr.msk.f32.gmra.mxu0 %vm365_vm0, %v339_v55 }
  0x63   : > { %1086 = vmatprep.mubr.msk.f32.mxu0 %vm365_vm0, %v340_v56 }
  0x66   : > { %1087 = vmatmul.mubr.msk.f32.gmra.mxu0 %vm365_vm0, %v340_v56 }
  0x92   : > { %v363_v62 = vpop.permute.xlu0 %362 }
  0x93   : > { %v353_v1 = vpop.permute.xlu1 %352 }
  0x96   : > { %v358_v3 = vpop.permute.xlu0 %357 }
  0x97   : > { %v348_v11 = vpop.permute.xlu1 %347 }
  0x9a   : > { %v590_v30 = vpop.permute.xlu0 %589 }
  0x9b   : > { %v595_v31 = vpop.permute.xlu1 %594 }
  0x9e   : > { %v600_v32 = vpop.permute.xlu0 %599 }
  0x9f   : > { %v605_v33 = vpop.permute.xlu1 %604 }
  0xa2   : > { %v792_v34 = vpop.permute.xlu0 %791 }
  0xa3   : > { %v797_v36 = vpop.permute.xlu1 %796 }
  0xa6   : > { %v610_v38 = vpop.permute.xlu0 %609 }
  0xa7   : > { %v802_v41 = vpop.permute.xlu1 %801 }
  0xaa   : > { %v615_v43 = vpop.permute.xlu0 %614 }
  0xab   : > { %v807_v51 = vpop.permute.xlu1 %806 }
 0x11a   : > { %v540_v58 = vpop.f32.mrf.mxu0 }
 0x11b   : > { %v541_v16 = vadd.f32 %v540_v58, %v348_v11 }
 0x11c   : > { %v542_v59 = vpop.f32.mrf.mxu0 }
 0x11d   : > { %v543_v14 = vadd.f32 %v542_v59, %v348_v11  ;;  %v563_v21 = vmax.f32 %v541_v16, 0.0 }
 0x11e   : > { %v546_v60 = vpop.f32.mrf.mxu0 }
 0x11f   : > { %v547_v12 = vadd.f32 %v546_v60, %v353_v1  ;;  %v564_v20 = vmax.f32 %v543_v14, 0.0 }
 0x120   : > { %v548_v61 = vpop.f32.mrf.mxu0 }
 0x121   : > { %v549_v9 = vadd.f32 %v548_v61, %v353_v1  ;;  %v565_v19 = vmax.f32 %v547_v12, 0.0 }
 0x122   : > { %v552_v63 = vpop.f32.mrf.mxu0 }
 0x123   : > { %v553_v8 = vadd.f32 %v552_v63, %v358_v3  ;;  %v566_v18 = vmax.f32 %v549_v9, 0.0 }
 0x124   : > { %v554_v0 = vpop.f32.mrf.mxu0 }
 0x125   : > { %v555_v6 = vadd.f32 %v554_v0, %v358_v3  ;;  %v567_v17 = vmax.f32 %v553_v8, 0.0 }
 0x126   : > { %v558_v2 = vpop.f32.mrf.mxu0 }
 0x127   : > { %v559_v4 = vadd.f32 %v558_v2, %v363_v62  ;;  %v568_v15 = vmax.f32 %v555_v6, 0.0  ;;  %v812_v6 = vpop.permute.xlu1 %811 }
 0x128   : > { %v560_v5 = vpop.f32.mrf.mxu0 }
 0x129   : > { %v561_v7 = vadd.f32 %v560_v5, %v363_v62  ;;  %v569_v13 = vmax.f32 %v559_v4, 0.0 }
 0x12b   : > { %v570_v10 = vmax.f32 %v561_v7, 0.0 }
 0x12d   : > { %676 = vmatprep.subr.mxu1 %v570_v10 }
 0x12e   : > { %677 = vmatpush1.msra.mxu1 %v569_v13 }
 0x12f   : > { %678 = vmatprep.subr.mxu1 %v568_v15 }
 0x130   : > { %679 = vmatpush1.msra.mxu1 %v567_v17 }
 0x131   : > { %680 = vmatprep.subr.mxu1 %v566_v18 }
 0x132   : > { %681 = vmatpush1.msra.mxu1 %v565_v19 }
 0x133   : > { %682 = vmatprep.subr.mxu1 %v564_v20 }
 0x134   : > { %683 = vmatpush1.msra.mxu1 %v563_v21 }
 0x135   : > { %1032 = vmatmul.mubr.msk.f32.vlgmr.msra.gmra.mxu1 %vm627_vm1, %v571_v22 }
 0x136   : > { %722 = vmatprep.mubr.f32.mxu1 %v1202_v57 }
 0x139   : > { %1033 = vmatmul.mubr.msk.f32.gmra.mxu1 %vm627_vm1, %v572_v23 }
 0x13a   : > { %728 = vmatprep.mubr.f32.mxu1 %v1202_v57 }
 0x13d   : > { %1034 = vmatmul.mubr.msk.f32.gmra.mxu1 %vm627_vm1, %v573_v24 }
 0x13e   : > { %734 = vmatprep.mubr.f32.mxu1 %v1202_v57 }
 0x141   : > { %1035 = vmatmul.mubr.msk.f32.gmra.mxu1 %vm627_vm1, %v574_v25 }
 0x142   : > { %740 = vmatprep.mubr.f32.mxu1 %v1202_v57 }
 0x145   : > { %1036 = vmatmul.mubr.msk.f32.gmra.mxu1 %vm627_vm1, %v575_v26 }
 0x146   : > { %746 = vmatprep.mubr.f32.mxu1 %v1202_v57 }
 0x149   : > { %1037 = vmatmul.mubr.msk.f32.gmra.mxu1 %vm627_vm1, %v576_v27 }
 0x14a   : > { %752 = vmatprep.mubr.f32.mxu1 %v1202_v57 }
 0x14d   : > { %1038 = vmatmul.mubr.msk.f32.gmra.mxu1 %vm627_vm1, %v577_v28 }
 0x14e   : > { %758 = vmatprep.mubr.f32.mxu1 %v1202_v57  ;;  %v620_v57 = vpop.permute.xlu0 %619 }
 0x151   : > { %1039 = vmatmul.mubr.msk.f32.gmra.mxu1 %vm627_vm1, %v578_v29  ;;  %v817_v29 = vpop.permute.xlu1 %816 }
 0x152   : > { %v625_v14 = vpop.permute.xlu0 %624 }
 0x1f5   : > { %v718_v35 = vpop.f32.mrf.mxu1 }
 0x1f6   : > { %v719_v46 = vadd.f32 %v718_v35, %v590_v30 }
 0x1f7   : > { %v720_v37 = vpop.f32.mrf.mxu1 }
 0x1f8   : > { %v721_v50 = vadd.f32 %v720_v37, %v590_v30  ;;  %v765_v56 = vmax.f32 %v719_v46, 0.0  ;;  %v822_v37 = vpop.permute.xlu0 %821 }
 0x1f9   : > { %v724_v39 = vpop.f32.mrf.mxu1 }
 0x1fa   : > { %v725_v44 = vadd.f32 %v724_v39, %v595_v31  ;;  %v766_v62 = vmax.f32 %v721_v50, 0.0  ;;  %v829_v4 = vmul.f32 %v792_v34, %v765_v56 }
 0x1fb   : > { %v726_v40 = vpop.f32.mrf.mxu1 }
 0x1fc   : > { %v727_v47 = vadd.f32 %v726_v40, %v595_v31  ;;  %v767_v52 = vmax.f32 %v725_v44, 0.0  ;;  %v830_v12 = vmul.f32 %v792_v34, %v766_v62 }
 0x1fd   : > { %v730_v42 = vpop.f32.mrf.mxu1 }
 0x1fe   : > { %v731_v48 = vadd.f32 %v730_v42, %v600_v32  ;;  %v768_v58 = vmax.f32 %v727_v47, 0.0  ;;  %v831_v0 = vmul.f32 %v797_v36, %v767_v52 }
 0x1ff   : > { %v732_v45 = vpop.f32.mrf.mxu1 }
 0x200   : > { %v733_v53 = vadd.f32 %v732_v45, %v600_v32  ;;  %v769_v59 = vmax.f32 %v731_v48, 0.0  ;;  %v832_v7 = vmul.f32 %v797_v36, %v768_v58  ;;  %v845_v15 = vadd.f32 %v831_v0, %v829_v4 }
 0x201   : > { %v736_v49 = vpop.f32.mrf.mxu1 }
 0x202   : > { %v737_v54 = vadd.f32 %v736_v49, %v605_v33  ;;  %v770_v1 = vmax.f32 %v733_v53, 0.0  ;;  %v833_v8 = vmul.f32 %v802_v41, %v769_v59  ;;  %v858_v22 = vadd.f32 %v832_v7, %v830_v12 }
 0x203   : > { %v738_v55 = vpop.f32.mrf.mxu1 }
 0x204   : > { %v739_v60 = vadd.f32 %v738_v55, %v605_v33  ;;  %v771_v2 = vmax.f32 %v737_v54, 0.0  ;;  %v834_v16 = vmul.f32 %v802_v41, %v770_v1  ;;  %v846_v23 = vadd.f32 %v845_v15, %v833_v8 }
 0x205   : > { %v742_v61 = vpop.f32.mrf.mxu1 }
 0x206   : > { %v743_v63 = vadd.f32 %v742_v61, %v610_v38  ;;  %v772_v9 = vmax.f32 %v739_v60, 0.0  ;;  %v835_v17 = vmul.f32 %v807_v51, %v771_v2  ;;  %v859_v30 = vadd.f32 %v858_v22, %v834_v16 }
 0x207   : > { %v744_v3 = vpop.f32.mrf.mxu1 }
 0x208   : > { %v745_v5 = vadd.f32 %v744_v3, %v610_v38  ;;  %v773_v10 = vmax.f32 %v743_v63, 0.0  ;;  %v836_v24 = vmul.f32 %v807_v51, %v772_v9  ;;  %v847_v31 = vadd.f32 %v846_v23, %v835_v17  ;;  %v827_v51 = vpop.permute.xlu1 %826 }
 0x209   : > { %v748_v11 = vpop.f32.mrf.mxu1 }
 0x20a   : > { %v749_v13 = vadd.f32 %v748_v11, %v615_v43  ;;  %v774_v18 = vmax.f32 %v745_v5, 0.0  ;;  %v837_v25 = vmul.f32 %v812_v6, %v773_v10  ;;  %v860_v38 = vadd.f32 %v859_v30, %v836_v24 }
 0x20b   : > { %v750_v19 = vpop.f32.mrf.mxu1  ;;  %v872_v5 = vstv %s871_s17 }
 0x20c   : > { %v775_v20 = vmax.f32 %v749_v13, 0.0  ;;  %v751_v21 = vadd.f32 %v750_v19, %v615_v43  ;;  %v838_v32 = vmul.f32 %v812_v6, %v774_v18  ;;  %v848_v39 = vadd.f32 %v847_v31, %v837_v25 }
 0x20d   : > { %v754_v26 = vpop.f32.mrf.mxu1  ;;  %v1203_v19 = vmov 1966171168  }
 0x20e   : > { %v776_v27 = vmax.f32 %v751_v21, 0.0  ;;  %v755_v28 = vadd.f32 %v754_v26, %v620_v57  ;;  %v839_v34 = vmul.f32 %v817_v29, %v775_v20  ;;  %v861_v45 = vadd.f32 %v860_v38, %v838_v32 }
 0x20f   : > { %v756_v33 = vpop.f32.mrf.mxu1  ;;  %v891_v20 = vunpack.c.l.s4 %v1203_v19  ;;  %v893_v21 = vlaneseq }
 0x210   : > { %v777_v35 = vmax.f32 %v755_v28, 0.0  ;;  %v757_v36 = vadd.f32 %v756_v33, %v620_v57  ;;  %v840_v41 = vmul.f32 %v817_v29, %v776_v27  ;;  %v849_v47 = vadd.f32 %v848_v39, %v839_v34 }
 0x211   : > { %v760_v40 = vpop.f32.mrf.mxu1  ;;  %v892_v22 = vunpack.c.0.s8 %v891_v20  ;;  %v894_v23 = vshrl.u32 %v893_v21, 7  ;;  %vm907_vm2 = vcmp.lt.s32.totalorder %v893_v21, 256 }
 0x212   : > { %v841_v42 = vmul.f32 %v822_v37, %v777_v35  ;;  %v778_v43 = vmax.f32 %v757_v36, 0.0  ;;  %v761_v44 = vadd.f32 %v760_v40, %v625_v14  ;;  %v862_v52 = vadd.f32 %v861_v45, %v840_v41 }
 0x213   : > { %v762_v46 = vpop.f32.mrf.mxu1  ;;  %v895_v25 = vsub.s32 %v892_v22, %v894_v23 }
 0x214   : > { %v842_v48 = vmul.f32 %v822_v37, %v778_v43  ;;  %v779_v49 = vmax.f32 %v761_v44, 0.0  ;;  %v763_v50 = vadd.f32 %v762_v46, %v625_v14  ;;  %v850_v53 = vadd.f32 %v849_v47, %v841_v42 }
 0x216   : > { %v843_v54 = vmul.f32 %v827_v51, %v779_v49  ;;  %v780_v55 = vmax.f32 %v763_v50, 0.0  ;;  %v863_v56 = vadd.f32 %v862_v52, %v842_v48 }
 0x218   : > { %v851_v57 = vadd.f32 %v850_v53, %v843_v54  ;;  %v844_v58 = vmul.f32 %v827_v51, %v780_v55 }
 0x21a   : > { %v852_v59 = vrot.slane %v851_v57, 4  ;;  %v864_v60 = vadd.f32 %v863_v56, %v844_v58 }
 0x21c   : > { %v853_v61 = vadd.f32 %v852_v59, %v851_v57  ;;  %v865_v62 = vrot.slane %v864_v60, 4 }
 0x21e   : > { %v854_v63 = vrot.slane %v853_v61, 2  ;;  %v866_v0 = vadd.f32 %v865_v62, %v864_v60 }
 0x220   : > { %v855_v1 = vadd.f32 %v854_v63, %v853_v61  ;;  %v867_v2 = vrot.slane %v866_v0, 2 }
 0x222   : > { %v856_v3 = vrot.slane %v855_v1, 1  ;;  %v868_v4 = vadd.f32 %v867_v2, %v866_v0 }
 0x224   : > { %v857_v6 = vadd.f32 %v856_v3, %v855_v1  ;;  %v869_v7 = vrot.slane %v868_v4, 1 }
 0x226   : > { %v873_v8 = vadd.f32 %v872_v5, %v857_v6  ;;  %v870_v9 = vadd.f32 %v869_v7, %v868_v4 }
 0x228   : > { %v875_v10 = vsub.f32 0.0, %v873_v8  ;;  %v874_v11 = vadd.f32 %v872_v5, %v870_v9 }
 0x22a   : > { %v877_v12 = vmul.f32 1.442695, %v875_v10  ;;  %v876_v13 = vsub.f32 0.0, %v874_v11 }
 0x22c   : > { %1131 = vpow2.f32 %v877_v12  ;;  %v879_v14 = vmul.f32 1.442695, %v876_v13 }
 0x22e   : > { %1133 = vpow2.f32 %v879_v14 }
 0x239   : > { %v1132_v15 = vpop.eup %1131 }
 0x23a   : > { %v881_v16 = vadd.f32 1.0, %v1132_v15 }
 0x23b   : > { %v1134_v17 = vpop.eup %1133 }
 0x23c   : > { %v882_v18 = vadd.f32 1.0, %v1134_v17  ;;  %1135 = vrcp.f32 %v881_v16 }
 0x23e   : > { %1137 = vrcp.f32 %v882_v18 }
 0x249   : > { %v1136_v24 = vpop.eup %1135 }
 0x24b   : > { %v1138_v26 = vpop.eup %1137 }
 0x24c   : > { %v889_v27 = vcombine.low %v1136_v24, %v1138_v26 }
 0x24e   : > { %v896_v28 = vrot.slane %v889_v27, %v895_v25  ;;  %917 = sbr.rel (!%p1286_p5) target bundleno = 621 (0x26d), region = 52 }
 0x250   : > { %v903_v29 = vrot.slane %v896_v28, %v895_v25 }
 0x252   : > { %909 = vst.msk [vmem:[%s285_s19] sm:$0x3] %vm907_vm2, %v903_v29 }
 0x253   : > { %s1553_s22 = smov (!%p920_p11, %s919_s22), 2 }
 0x254   : > { %s1496_s23 = sshll.u32 %s1553_s22, 4 }
 0x255   : > { %s924_s24 = ssub.s32 32, %s1496_s23 }
 0x256   : > { %925 = vsyncadd %s1491_s20, %s924_s24  ;;  %p1043_p12 = scmp.ne.s32.totalorder %s1496_s23, 0  ;;  %s928_s12 = scalar_lea.hbm %s1545_s7, %s1297_s14 }
 0x257   : > { %s930_s30 = sshll.u32 %s285_s19, 4  ;;  %s1204_s9 = smov [#allocation3]   ;;  %s931_s30 = int_to_ptr.vmem [resolvable:$true] %s930_s30 }
 0x258   : > { %s1139_s6 = scalar_lea.vmem %s931_s30, %s1496_s23  ;;  %s1143_s10 = sshll.u32 %s1204_s9, 4  ;;  %s1144_s10 = int_to_ptr.vmem [resolvable:$false] %s1143_s10 }
 0x259   : > { %p1140_p13 = scmp.ne.s32.totalorder %s931_s30, %s1139_s6  ;;  %s1145_s16 = scalar_lea.vmem %s1144_s10, 64 }
 0x25a   : > { %p1146_p2 = scmp.lt.s32.totalorder %s931_s30, %s1144_s10  ;;  %p1147_p3 = scmp.lt.s32.totalorder %s1145_s16, %s1139_s6 }
 0x25b   : > { %p1141_p0 = pnand %p1140_p13, %p1043_p12 }
 0x25c   : > { %p1148_p4 = por %p1147_p3, %p1146_p2 }
 0x25d   : > { %p1142_p1 = pneg %p1141_p0 }
 0x25f   : > { %p1149_p5 = pnand %p1148_p4, %p1142_p1 }
 0x261   : > { %1152 = shalt.err (!%p1149_p5)
}
 0x262   : > { %s1153_s17 = scalar_lea.hbm %s928_s12, %s1496_s23  ;;  %s1157_s19 = scalar_lea.hbm %s1545_s7, 48 }
 0x263   : > { %p1154_p7 = scmp.ne.s32.totalorder %s928_s12, %s1153_s17  ;;  %p1158_p10 = scmp.lt.s32.totalorder %s928_s12, %s1545_s7 }
 0x264   : > { %p1159_p11 = scmp.lt.s32.totalorder %s1157_s19, %s1153_s17 }
 0x265   : > { %p1155_p8 = pnand %p1154_p7, %p1043_p12 }
 0x266   : > { %p1160_p13 = por %p1159_p11, %p1158_p10 }
 0x267   : > { %p1156_p9 = pneg %p1155_p8 }
 0x269   : > { %p1161_p0 = pnand %p1160_p13, %p1156_p9 }
 0x26b   : > { %1164 = shalt.err (!%p1161_p0)
}
 0x26c   : > { %933 = dma.vmem_to_hbm [thread:$0]  (%p1043_p12), %s931_s30, %s1496_s23, %s928_s12, %s1491_s20  }
 0x26d PF: > { %p1093_p1 = scmp.ge.s32.totalorder %s1199_s29, 2  ;;  %s942_s24 = sand.u32 1, %s1187_s26  }
 0x26e   : > { %s943_s25 = scalar_lea.sflag [#allocation4], %s942_s24 }
 0x26f   : > { %p1090_p2 = pnand %p1093_p1, %p1290_p6 }
 0x271   : > { %p1091_p3 = pneg %p1090_p2 }
 0x273   : > { %1182 = dma.done.wait (%p1091_p3), %s943_s25, 32  }
 0x274   : > { %1184 = vsyncadd (%p1091_p3), %s943_s25, 4294967264  ;;  %p18_p4 = scmp.ge.s32.totalorder %s1273_s8, 4   ;;  %s1548_s26 = smov %s1191_s27 }
 0x275   : > { %s1549_s27 = smov %s1195_s28  ;;  %s1550_s28 = smov %s1284_s11 }
 0x276   : > { %s1551_s29 = smov %s1273_s8  ;;  %20 = sbr.rel (!%p18_p4) target bundleno = 5 (0x5), region = 83 }
 0x27b   :  { %948 = vsyncpa [#allocation4], 1 }
 0x27c   :  { %950 = vsyncpa [#allocation4 + $0x1], 1 }

</bundles_post_ra>
